<compile_context>
chip_gen: v7x
topology: tpu7x:2x2x1
jax: 0.10.0
libtpu: 0.0.40
codegen_flags: <defaults>
</compile_context>

<pallas_src>
import math

import jax
import jax.numpy as jnp
from jax.experimental import pallas as pl
from jax.experimental.pallas import tpu as pltpu

_PER_BLOCK_BUDGET = 6 * 1024 * 1024   # bytes per block per array
_VMEM_LIMIT_BYTES = 32 << 20          # explicit scoped-VMEM limit (safe v5e/v6e/v7x)
_TWO_TC_THRESHOLD = 8 << 20           # split rows across 2 TCs above this size (v7x)


def _copy_kernel(x_ref, o_ref):
    # Materialize the flattened view: straight VMEM copy of the current block.
    o_ref[...] = x_ref[...]


def conv_fc_view(x):
    """Preferred path: zero-copy flatten (bitcast on default-layout arrays).

    Semantics identical to PyTorch's x.reshape(x.size(0), -1) on a contiguous
    tensor.  Zero HBM traffic; fuse into the consumer whenever possible.
    """
    return jnp.reshape(x, (x.shape[0], -1))


def conv_fc_view_materialized(x, *, alias_input_output=False):
    """Pallas copy kernel that materializes the flattened (N, C*H*W) tensor.

    Only use when a fresh contiguous buffer is required; otherwise prefer
    `conv_fc_view` (no kernel, no HBM traffic).
    """
    n = x.shape[0]
    d = math.prod(x.shape[1:]) if len(x.shape) > 1 else 1

    # Row-major flatten of trailing dims (metadata-only on default layout).
    # TODO(synk): if x ever arrives with a non-default physical layout, pass
    # the 4D array into pallas_call and do the relayout in VMEM instead.
    x2 = jnp.reshape(x, (n, d))
    itemsize = jnp.dtype(x2.dtype).itemsize
    bytes_per_row = max(d * itemsize, 1)
    rows_per_budget = _PER_BLOCK_BUDGET // bytes_per_row

    if rows_per_budget >= n:
        # Whole array fits in a single block.
        block_rows = n
        total_bytes = n * bytes_per_row
        if total_bytes > _TWO_TC_THRESHOLD and n >= 16:
            # Large single-block case: force >= 2 grid steps (8-aligned) so the
            # parallel axis can split across both v7x TensorCores.
            block_rows = max(8, ((n // 2) // 8) * 8)
        grid = (pl.cdiv(n, block_rows),)
        in_specs = [pl.BlockSpec((block_rows, d), lambda i: (i, 0))]
        out_specs = pl.BlockSpec((block_rows, d), lambda i: (i, 0))
        dim_semantics = ("parallel",)
    elif rows_per_budget >= 8:
        # Row tiling: full (lane-dense) rows, 8-aligned row blocks.
        block_rows = (rows_per_budget // 8) * 8
        grid = (pl.cdiv(n, block_rows),)
        in_specs = [pl.BlockSpec((block_rows, d), lambda i: (i, 0))]
        out_specs = pl.BlockSpec((block_rows, d), lambda i: (i, 0))
        dim_semantics = ("parallel",)
    else:
        # Large-d fallback: a budget-sized block holds < 8 rows (or < 1 row).
        # Tile along the flattened dim with lane-multiple chunks instead of
        # inflating the row block past the VMEM budget.
        block_rows = n if n <= 8 else 8
        max_cols = _PER_BLOCK_BUDGET // (block_rows * itemsize)
        d_tile = min(d, max(128, (max_cols // 128) * 128))
        grid = (pl.cdiv(n, block_rows), pl.cdiv(d, d_tile))
        in_specs = [pl.BlockSpec((block_rows, d_tile), lambda i, j: (i, j))]
        out_specs = pl.BlockSpec((block_rows, d_tile), lambda i, j: (i, j))
        dim_semantics = ("parallel", "parallel")

    kwargs = {}
    if alias_input_output:
        # Only a win when the caller donates the input buffer; otherwise XLA
        # inserts a defensive copy of x2 first.
        kwargs["input_output_aliases"] = {0: 0}

    return pl.pallas_call(
        _copy_kernel,
        out_shape=jax.ShapeDtypeStruct((n, d), x2.dtype),
        grid=grid,
        in_specs=in_specs,
        out_specs=out_specs,
        compiler_params=pltpu.CompilerParams(
            dimension_semantics=dim_semantics,
            vmem_limit_bytes=_VMEM_LIMIT_BYTES,
        ),
        **kwargs,
    )(x2)


if __name__ == "__main__":
    key = jax.random.PRNGKey(0)
    # Small shape consistent with a conv feature map feeding an FC layer:
    # batch=2, channels=4, spatial=16x16 -> flattened dim 1024 (lane-dense).
    x = jax.random.normal(key, (2, 4, 16, 16), jnp.float32)

    ref = jnp.reshape(x, (x.shape[0], -1))

    # Preferred zero-copy path (the actual "optimization" for this module).
    out_view = jax.block_until_ready(conv_fc_view(x))

    # Pallas materializing kernel (runs the copy kernel once).
    out_kernel = jax.block_until_ready(conv_fc_view_materialized(x))

    assert out_view.shape == (2, 4 * 16 * 16), out_view.shape
    assert out_kernel.shape == (2, 4 * 16 * 16), out_kernel.shape
    assert bool(jnp.array_equal(out_view, ref)), "view flatten mismatch vs reference"
    assert bool(jnp.array_equal(out_kernel, ref)), "kernel flatten mismatch vs reference"
    print("KERNEL_OK")
</pallas_src>

<mosaic_0001>
module attributes {stable_mosaic.version = 11 : i64} {
  func.func @_copy_kernel(%arg0: i32, %arg1: memref<2x1024xf32, #tpu.memory_space<vmem>>, %arg2: memref<2x1024xf32, #tpu.memory_space<vmem>>) attributes {dimension_semantics = [#tpu.dimension_semantics<parallel>], iteration_bounds = array<i64: 1>, scalar_prefetch = 0 : i64, scratch_operands = 0 : i64, tpu.core_type = #tpu.core_type<tc>, window_params = [{transform_indices = @transform_0, window_bounds = array<i64: 2, 1024>}, {transform_indices = @transform_1, window_bounds = array<i64: 2, 1024>}]} {
    %c0 = arith.constant 0 : index
    %c0_0 = arith.constant 0 : index
    %0 = vector.load %arg1[%c0, %c0_0] : memref<2x1024xf32, #tpu.memory_space<vmem>>, vector<2x1024xf32>
    %c0_1 = arith.constant 0 : index
    %c0_2 = arith.constant 0 : index
    %1 = vector.load %arg2[%c0_1, %c0_2] : memref<2x1024xf32, #tpu.memory_space<vmem>>, vector<2x1024xf32>
    tpu.vector_store %arg2[%c0_1, %c0_2], %0 {strides = array<i32>} : memref<2x1024xf32, #tpu.memory_space<vmem>>, vector<2x1024xf32>,
    return
  }
  func.func @transform_0(%arg0: i32) -> (i32, i32) {
    %c0_i32 = arith.constant 0 : i32
    %c0_i32_0 = arith.constant 0 : i32
    return %arg0, %c0_i32 : i32, i32
  }
  func.func @transform_1(%arg0: i32) -> (i32, i32) {
    %c0_i32 = arith.constant 0 : i32
    %c0_i32_0 = arith.constant 0 : i32
    return %arg0, %c0_i32 : i32, i32
  }
}

</mosaic_0001>

<bundles_post_ra>
// kernel: tpu_custom_call.1
= control target key start
LH: loop header
LB: loop body
LE: loop exit
PB: predicated region body
PF: predicated region fallthrough
CT: control target
= control target key end

     0   :  { %6 = vsyncpa [#allocation3], 0  ;;  %s126_s0 = inlined_call_operand.hbm [shape: f32[2,1024], index: 0, kind: input, shape index: {}]   ;;  %s127_s1 = inlined_call_operand.hbm [shape: f32[2,1024], index: 1, kind: output, shape index: {}]  }
   0x1   :  { %7 = vsyncpa [#allocation4], 0  ;;  %s90_s6 = smov [#allocation2]   ;;  %s42_s10 = scalar_lea.hbm %s126_s0, 256 }
   0x2   :  { %s14_s7 = sshll.u32 %s90_s6, 4  ;;  %p43_p0 = scmp.ne.s32.totalorder %s126_s0, %s42_s10  ;;  %s15_s7 = int_to_ptr.vmem [resolvable:$true] %s14_s7 }
   0x3   :  { %p46_p1 = scmp.lt.u32.totalorder %s42_s10, %s126_s0 }
   0x5   :  { %p48_p2 = pnand %p46_p1, %p43_p0 }
   0x7   :  { %51 = shalt.err (!%p48_p2)
}
   0x8   :  { %s52_s15 = scalar_lea.vmem %s15_s7, 256  ;;  %p57_p4 = scmp.lt.s32.totalorder %s15_s7, %s15_s7 }
   0x9   :  { %p53_p3 = scmp.ne.s32.totalorder %s15_s7, %s52_s15  ;;  %p58_p5 = scmp.lt.s32.totalorder %s52_s15, %s52_s15 }
   0xb   :  { %p59_p6 = por %p58_p5, %p57_p4 }
   0xd   :  { %p60_p7 = pnand %p59_p6, %p53_p3 }
   0xf   :  { %63 = shalt.err (!%p60_p7)
}
  0x10   :  { %17 = dma.hbm_to_vmem [thread:$0]  %s126_s0, 256, %s15_s7, [#allocation3]  }
  0x11   :  { %86 = dma.done.wait [#allocation3], 256  }
  0x12   :  { %87 = vsyncadd [#allocation3], 4294967040  ;;  %s91_s18 = smov [#allocation5]   ;;  %v21_v0 = vld [vmem:[#allocation2] sm:$0xff]  ;;  %v22_v1 = vld [vmem:[#allocation2 + $0x8] sm:$0xff] }
  0x13   :  { %s31_s19 = sshll.u32 %s91_s18, 4  ;;  %23 = vst [vmem:[#allocation5] sm:$0xff] %v21_v0  ;;  %24 = vst [vmem:[#allocation5 + $0x8] sm:$0xff] %v22_v1  ;;  %s32_s19 = int_to_ptr.vmem [resolvable:$true] %s31_s19 }
  0x14   :  { %s64_s20 = scalar_lea.vmem %s32_s19, 256  ;;  %p69_p9 = scmp.lt.s32.totalorder %s32_s19, %s32_s19 }
  0x15   :  { %p65_p8 = scmp.ne.s32.totalorder %s32_s19, %s64_s20  ;;  %p70_p10 = scmp.lt.s32.totalorder %s64_s20, %s64_s20 }
  0x17   :  { %p71_p11 = por %p70_p10, %p69_p9 }
  0x19   :  { %p72_p12 = pnand %p71_p11, %p65_p8 }
  0x1b   :  { %75 = shalt.err (!%p72_p12)
}
  0x1c   :  { %s76_s0 = scalar_lea.hbm %s127_s1, 256 }
  0x1d   :  { %p77_p13 = scmp.ne.s32.totalorder %s127_s1, %s76_s0  ;;  %p80_p0 = scmp.lt.u32.totalorder %s76_s0, %s127_s1 }
  0x1f   :  { %p82_p1 = pnand %p80_p0, %p77_p13 }
  0x21   :  { %85 = shalt.err (!%p82_p1)
}
  0x22   :  { %34 = dma.vmem_to_hbm [thread:$0]  %s32_s19, 256, %s127_s1, [#allocation4]  }
  0x23   :  { %88 = dma.done.wait [#allocation4], 256  }
  0x24   :  { %89 = vsyncadd [#allocation4], 4294967040 }
  0x25   :  { %38 = vsyncpa [#allocation3], 1 }
  0x26   :  { %39 = vsyncpa [#allocation4], 1 }

</bundles_post_ra>
